<compile_context>
chip_gen: v7x
topology: tpu7x:2x2x1
jax: 0.10.0
libtpu: 0.0.40
codegen_flags: <defaults>
</compile_context>

<pallas_src>
import math

import jax
import jax.numpy as jnp
from jax.experimental import pallas as pl
from jax.experimental.pallas import tpu as pltpu


def _round_up(n, m):
    return ((n + m - 1) // m) * m


def _critic_kernel(x_ref, u_ref, w1x_ref, w1u_ref, b1_ref,
                   w2_ref, b2_ref, w3_ref, b3_ref, out_ref):
    """One batch tile through the 3-layer critic MLP.

    concat([x, u]) is fused by splitting W1 into state/action row blocks and
    summing two dots. All dots accumulate in f32 on the MXU; bias/ReLU/sigmoid
    stay f32 on the VPU; activations are cast to the weight dtype only right
    before the next dot (bf16-weight friendly, v5e-safe).
    """
    wdt = w1x_ref.dtype
    # Layer 1: x @ W1x + u @ W1u + b1, ReLU.
    h1 = (jnp.dot(x_ref[...].astype(wdt), w1x_ref[...],
                  preferred_element_type=jnp.float32)
          + jnp.dot(u_ref[...].astype(wdt), w1u_ref[...],
                    preferred_element_type=jnp.float32)
          + b1_ref[...])
    h1 = jnp.maximum(h1, 0.0)
    # Layer 2: (B, 512) @ (512, 384) + b2, ReLU.
    h2 = jnp.dot(h1.astype(wdt), w2_ref[...],
                 preferred_element_type=jnp.float32) + b2_ref[...]
    h2 = jnp.maximum(h2, 0.0)
    # Layer 3: (B, 384) @ (384, A_pad) + b3, sigmoid.
    h3 = jnp.dot(h2.astype(wdt), w3_ref[...],
                 preferred_element_type=jnp.float32) + b3_ref[...]
    out_ref[...] = jax.nn.sigmoid(h3).astype(out_ref.dtype)


def critic_forward(x, u, params, *, batch_tile=128):
    """x: (B, state_dim), u: (B, action_dim) -> (B, action_dim) in [0, 1]."""
    w1x, w1u, b1, w2, b2, w3, b3 = params
    B, state_dim = x.shape
    action_dim = u.shape[1]
    h1p, h2p = w2.shape[0], w3.shape[0]
    a_pad = w3.shape[1]

    flops = 2 * B * (state_dim * h1p + action_dim * h1p + h1p * h2p + h2p * a_pad)
    bytes_accessed = (
        sum(int(p.size) * p.dtype.itemsize for p in params)
        + int(x.size) * x.dtype.itemsize
        + int(u.size) * u.dtype.itemsize
        + B * a_pad * 4
    )
    cost = pl.CostEstimate(flops=flops, transcendentals=B * a_pad,
                           bytes_accessed=bytes_accessed)

    if B <= batch_tile:
        # Latency-bound regime: single grid-less call, everything VMEM-resident.
        out = pl.pallas_call(
            _critic_kernel,
            out_shape=jax.ShapeDtypeStruct((B, a_pad), jnp.float32),
            in_specs=[pl.BlockSpec(memory_space=pltpu.MemorySpace.VMEM)] * 9,
            out_specs=pl.BlockSpec(memory_space=pltpu.MemorySpace.VMEM),
            compiler_params=pltpu.CompilerParams(vmem_limit_bytes=8 << 20),
            cost_estimate=cost,
        )(x, u, w1x, w1u, b1, w2, b2, w3, b3)
    else:
        # Training-size batches: tile the batch, keep weights VMEM-resident via
        # constant index_maps; pipeliner overlaps activation DMA with the matmuls;
        # "parallel" lets v7x shard the batch axis across its two TensorCores.
        tb = batch_tile
        b_pad = _round_up(B, tb)
        if b_pad != B:
            x = jnp.pad(x, ((0, b_pad - B), (0, 0)))
            u = jnp.pad(u, ((0, b_pad - B), (0, 0)))
        const = lambda i: (0, 0)
        out = pl.pallas_call(
            _critic_kernel,
            out_shape=jax.ShapeDtypeStruct((b_pad, a_pad), jnp.float32),
            grid=(b_pad // tb,),
            in_specs=[
                pl.BlockSpec((tb, state_dim), lambda i: (i, 0)),
                pl.BlockSpec((tb, action_dim), lambda i: (i, 0)),
                pl.BlockSpec(w1x.shape, const),
                pl.BlockSpec(w1u.shape, const),
                pl.BlockSpec(b1.shape, const),
                pl.BlockSpec(w2.shape, const),
                pl.BlockSpec(b2.shape, const),
                pl.BlockSpec(w3.shape, const),
                pl.BlockSpec(b3.shape, const),
            ],
            out_specs=pl.BlockSpec((tb, a_pad), lambda i: (i, 0)),
            compiler_params=pltpu.CompilerParams(
                dimension_semantics=("parallel",),
                vmem_limit_bytes=8 << 20),
            cost_estimate=cost,
        )(x, u, w1x, w1u, b1, w2, b2, w3, b3)

    return out[:B, :action_dim]


def init_critic_params(key, state_dim, action_dim, *, weight_dtype=jnp.float32):
    """MXU/lane-aligned (zero-padded) params.

    Weights are stored (in_features, out_features); hidden/output feature dims
    are zero-padded to 128 multiples (400->512, 300->384, action_dim->128). W1
    is pre-split into its state/action row blocks so the kernel fuses the
    concat. Init matches torch nn.Linear default U[-1/sqrt(fan_in), +1/sqrt(fan_in)].
    Biases stay f32 even when weights are bf16 (f32 VPU math in-kernel).
    """
    h1p = _round_up(400, 128)            # 512
    h2p = _round_up(300, 128)            # 384
    a_pad = _round_up(action_dim, 128)   # 128 for small action_dim

    def linear(k, fan_in, fan_out, pad_in, pad_out):
        kw, kb = jax.random.split(k)
        bound = 1.0 / math.sqrt(fan_in)
        w = jax.random.uniform(kw, (fan_in, fan_out), jnp.float32, -bound, bound)
        b = jax.random.uniform(kb, (1, fan_out), jnp.float32, -bound, bound)
        w = jnp.pad(w, ((0, pad_in - fan_in), (0, pad_out - fan_out)))
        b = jnp.pad(b, ((0, 0), (0, pad_out - fan_out)))
        return w, b

    k1, k2, k3 = jax.random.split(key, 3)
    w1, b1 = linear(k1, state_dim + action_dim, 400, state_dim + action_dim, h1p)
    w1x, w1u = w1[:state_dim], w1[state_dim:]
    w2, b2 = linear(k2, 400, 300, h1p, h2p)
    w3, b3 = linear(k3, 300, action_dim, h2p, a_pad)
    wd = weight_dtype
    return (w1x.astype(wd), w1u.astype(wd), b1,
            w2.astype(wd), b2, w3.astype(wd), b3)


def _reference_forward(x, u, params):
    """Plain-JAX reference (uses the same padded params; padding is exact zeros)."""
    w1x, w1u, b1, w2, b2, w3, b3 = params
    w1x, w1u, w2, w3 = (w.astype(jnp.float32) for w in (w1x, w1u, w2, w3))
    h = jnp.maximum(x @ w1x + u @ w1u + b1, 0.0)
    h = jnp.maximum(h @ w2 + b2, 0.0)
    q = jax.nn.sigmoid(h @ w3 + b3)
    return q[:, :u.shape[1]]


if __name__ == "__main__":
    state_dim, action_dim = 12, 4
    key = jax.random.PRNGKey(0)
    kx, ku, kp = jax.random.split(key, 3)

    # --- small batch: grid-less latency path, f32 weights (exact) ---
    batch = 8
    x = jax.random.normal(kx, (batch, state_dim), jnp.float32)
    u = jax.random.normal(ku, (batch, action_dim), jnp.float32)
    params_f32 = init_critic_params(kp, state_dim, action_dim)
    out = jax.block_until_ready(critic_forward(x, u, params_f32))
    ref = _reference_forward(x, u, params_f32)
    assert out.shape == (batch, action_dim)
    assert jnp.allclose(out, ref, atol=1e-5, rtol=1e-5), "f32 path mismatch"

    # --- larger batch: batch-tiled grid path, bf16 weights (v6e/v7x MXU path) ---
    big_batch = 200  # deliberately not a multiple of the 128 batch tile
    xb = jax.random.normal(kx, (big_batch, state_dim), jnp.float32)
    ub = jax.random.normal(ku, (big_batch, action_dim), jnp.float32)
    params_bf16 = init_critic_params(kp, state_dim, action_dim,
                                     weight_dtype=jnp.bfloat16)
    out_b = jax.block_until_ready(critic_forward(xb, ub, params_bf16))
    ref_b = _reference_forward(xb, ub, params_bf16)
    assert out_b.shape == (big_batch, action_dim)
    assert jnp.allclose(out_b, ref_b, atol=3e-2, rtol=3e-2), "bf16 path mismatch"

    print("KERNEL_OK")
</pallas_src>

<mosaic_0001>
module attributes {stable_mosaic.version = 11 : i64} {
  func.func @_critic_kernel(%arg0: memref<8x12xf32, #tpu.memory_space<vmem>>, %arg1: memref<8x4xf32, #tpu.memory_space<vmem>>, %arg2: memref<12x512xf32, #tpu.memory_space<vmem>>, %arg3: memref<4x512xf32, #tpu.memory_space<vmem>>, %arg4: memref<1x512xf32, #tpu.memory_space<vmem>>, %arg5: memref<512x384xf32, #tpu.memory_space<vmem>>, %arg6: memref<1x384xf32, #tpu.memory_space<vmem>>, %arg7: memref<384x128xf32, #tpu.memory_space<vmem>>, %arg8: memref<1x128xf32, #tpu.memory_space<vmem>>, %arg9: memref<8x128xf32, #tpu.memory_space<vmem>>) attributes {dimension_semantics = [], scalar_prefetch = 0 : i64, scratch_operands = 0 : i64, tpu.core_type = #tpu.core_type<tc>} {
    %c0 = arith.constant 0 : index
    %c0_0 = arith.constant 0 : index
    %0 = vector.load %arg0[%c0, %c0_0] : memref<8x12xf32, #tpu.memory_space<vmem>>, vector<8x12xf32>
    %c0_1 = arith.constant 0 : index
    %c0_2 = arith.constant 0 : index
    %1 = vector.load %arg2[%c0_1, %c0_2] : memref<12x512xf32, #tpu.memory_space<vmem>>, vector<12x512xf32>
    %cst = arith.constant dense<0.000000e+00> : vector<8x512xf32>
    %2 = tpu.matmul %0, %1, %cst {dimension_numbers = #tpu.dot_dimension_numbers<[1], [0], [0], [1], [0, 0, 1, 1], [], []>} : vector<8x12xf32>, vector<12x512xf32>, vector<8x512xf32> -> vector<8x512xf32>
    %c0_3 = arith.constant 0 : index
    %c0_4 = arith.constant 0 : index
    %3 = vector.load %arg1[%c0_3, %c0_4] : memref<8x4xf32, #tpu.memory_space<vmem>>, vector<8x4xf32>
    %c0_5 = arith.constant 0 : index
    %c0_6 = arith.constant 0 : index
    %4 = vector.load %arg3[%c0_5, %c0_6] : memref<4x512xf32, #tpu.memory_space<vmem>>, vector<4x512xf32>
    %cst_7 = arith.constant dense<0.000000e+00> : vector<8x512xf32>
    %5 = tpu.matmul %3, %4, %cst_7 {dimension_numbers = #tpu.dot_dimension_numbers<[1], [0], [0], [1], [0, 0, 1, 1], [], []>} : vector<8x4xf32>, vector<4x512xf32>, vector<8x512xf32> -> vector<8x512xf32>
    %6 = arith.addf %2, %5 : vector<8x512xf32>
    %c0_8 = arith.constant 0 : index
    %c0_9 = arith.constant 0 : index
    %7 = vector.load %arg4[%c0_8, %c0_9] : memref<1x512xf32, #tpu.memory_space<vmem>>, vector<1x512xf32>
    %8 = vector.broadcast %7 : vector<1x512xf32> to vector<8x512xf32>
    %9 = arith.addf %6, %8 : vector<8x512xf32>
    %cst_10 = arith.constant 0.000000e+00 : f32
    %10 = vector.broadcast %cst_10 : f32 to vector<8x512xf32>
    %11 = arith.maximumf %9, %10 : vector<8x512xf32>
    %c0_11 = arith.constant 0 : index
    %c0_12 = arith.constant 0 : index
    %12 = vector.load %arg5[%c0_11, %c0_12] : memref<512x384xf32, #tpu.memory_space<vmem>>, vector<512x384xf32>
    %cst_13 = arith.constant dense<0.000000e+00> : vector<8x384xf32>
    %13 = tpu.matmul %11, %12, %cst_13 {dimension_numbers = #tpu.dot_dimension_numbers<[1], [0], [0], [1], [0, 0, 1, 1], [], []>} : vector<8x512xf32>, vector<512x384xf32>, vector<8x384xf32> -> vector<8x384xf32>
    %c0_14 = arith.constant 0 : index
    %c0_15 = arith.constant 0 : index
    %14 = vector.load %arg6[%c0_14, %c0_15] : memref<1x384xf32, #tpu.memory_space<vmem>>, vector<1x384xf32>
    %15 = vector.broadcast %14 : vector<1x384xf32> to vector<8x384xf32>
    %16 = arith.addf %13, %15 : vector<8x384xf32>
    %cst_16 = arith.constant 0.000000e+00 : f32
    %17 = vector.broadcast %cst_16 : f32 to vector<8x384xf32>
    %18 = arith.maximumf %16, %17 : vector<8x384xf32>
    %c0_17 = arith.constant 0 : index
    %c0_18 = arith.constant 0 : index
    %19 = vector.load %arg7[%c0_17, %c0_18] : memref<384x128xf32, #tpu.memory_space<vmem>>, vector<384x128xf32>
    %cst_19 = arith.constant dense<0.000000e+00> : vector<8x128xf32>
    %20 = tpu.matmul %18, %19, %cst_19 {dimension_numbers = #tpu.dot_dimension_numbers<[1], [0], [0], [1], [0, 0, 1, 1], [], []>} : vector<8x384xf32>, vector<384x128xf32>, vector<8x128xf32> -> vector<8x128xf32>
    %c0_20 = arith.constant 0 : index
    %c0_21 = arith.constant 0 : index
    %21 = vector.load %arg8[%c0_20, %c0_21] : memref<1x128xf32, #tpu.memory_space<vmem>>, vector<1x128xf32>
    %22 = vector.broadcast %21 : vector<1x128xf32> to vector<8x128xf32>
    %23 = arith.addf %20, %22 : vector<8x128xf32>
    %24 = arith.negf %23 : vector<8x128xf32>
    %25 = math.exp %24 : vector<8x128xf32>
    %cst_22 = arith.constant 1.000000e+00 : f32
    %26 = vector.broadcast %cst_22 : f32 to vector<8x128xf32>
    %27 = arith.addf %26, %25 : vector<8x128xf32>
    %28 = arith.divf %26, %27 : vector<8x128xf32>
    %c0_23 = arith.constant 0 : index
    %c0_24 = arith.constant 0 : index
    %29 = vector.load %arg9[%c0_23, %c0_24] : memref<8x128xf32, #tpu.memory_space<vmem>>, vector<8x128xf32>
    tpu.vector_store %arg9[%c0_23, %c0_24], %28 {strides = array<i32>} : memref<8x128xf32, #tpu.memory_space<vmem>>, vector<8x128xf32>,
    return
  }
}

</mosaic_0001>

<bundles_post_ra>
// kernel: tpu_custom_call.1
= control target key start
LH: loop header
LB: loop body
LE: loop exit
PB: predicated region body
PF: predicated region fallthrough
CT: control target
= control target key end

     0   :  { %14 = vsyncpa [#allocation3], 0  ;;  %s1935_s0 = inlined_call_operand.hbm [shape: f32[8,12], index: 0, kind: input, shape index: {}]   ;;  %s1936_s1 = inlined_call_operand.vmem [shape: f32[8,4], index: 1, kind: input, shape index: {}]   ;;  %s1937_s2 = inlined_call_operand.hbm [shape: f32[12,512], index: 2, kind: input, shape index: {}]   ;;  %s1938_s3 = inlined_call_operand.vmem [shape: f32[4,512], index: 3, kind: input, shape index: {}]   ;;  %s1939_s4 = inlined_call_operand.vmem [shape: f32[1,512], index: 4, kind: input, shape index: {}]   ;;  %s1940_s5 = inlined_call_operand.hbm [shape: f32[512,384], index: 5, kind: input, shape index: {}]   ;;  %s1941_s6 = inlined_call_operand.vmem [shape: f32[1,384], index: 6, kind: input, shape index: {}]   ;;  %s1942_s7 = inlined_call_operand.hbm [shape: f32[384,128], index: 7, kind: input, shape index: {}]   ;;  %s1943_s8 = inlined_call_operand.vmem [shape: f32[1,128], index: 8, kind: input, shape index: {}]   ;;  %s1944_s9 = inlined_call_operand.hbm [shape: f32[8,128], index: 9, kind: output, shape index: {}]  }
   0x1   :  { %15 = vsyncpa [#allocation6], 0 }
   0x2   :  { %16 = vsyncpa [#allocation9], 0 }
   0x3   :  { %17 = vsyncpa [#allocation4], 0  ;;  %s1736_s30 = smov [#allocation5]   ;;  %s1618_s13 = scalar_lea.hbm %s1937_s2, 1024 }
   0x4   :  { %s35_s10 = sshll.u32 %s1736_s30, 4  ;;  %p1619_p0 = scmp.ne.s32.totalorder %s1937_s2, %s1618_s13  ;;  %s36_s10 = int_to_ptr.vmem [resolvable:$true] %s35_s10 }
   0x5   :  { %p1622_p1 = scmp.lt.u32.totalorder %s1618_s13, %s1937_s2 }
   0x7   :  { %p1624_p2 = pnand %p1622_p1, %p1619_p0 }
   0x9   :  { %1627 = shalt.err (!%p1624_p2)
}
   0xa   :  { %s1628_s18 = scalar_lea.vmem %s36_s10, 1024  ;;  %p1633_p4 = scmp.lt.s32.totalorder %s36_s10, %s36_s10 }
   0xb   :  { %p1629_p3 = scmp.ne.s32.totalorder %s36_s10, %s1628_s18  ;;  %p1634_p5 = scmp.lt.s32.totalorder %s1628_s18, %s1628_s18 }
   0xd   :  { %p1635_p6 = por %p1634_p5, %p1633_p4 }
   0xf   :  { %p1636_p7 = pnand %p1635_p6, %p1629_p3 }
  0x11   :  { %1639 = shalt.err (!%p1636_p7)
}
  0x12   :  { %s1737_s19 = smov 512   ;;  %s1738_s20 = smov 32  }
  0x13   :  { %41 = dma.hbm_to_vmem [thread:$0]  %s1937_s2, 1024, %s36_s10, [#allocation6], %s1737_s19, %s1737_s19, %s1738_s20  }
  0x14   :  { %s1739_s23 = smov [#allocation2]   ;;  %s1740_s25 = smov [#allocation7]  }
  0x15   :  { %s24_s24 = sshll.u32 %s1739_s23, 4  ;;  %s51_s26 = sshll.u32 %s1740_s25, 4  ;;  %s25_s24 = int_to_ptr.vmem [resolvable:$true] %s24_s24  ;;  %s52_s26 = int_to_ptr.vmem [resolvable:$true] %s51_s26 }
  0x16   :  { %s1640_s29 = scalar_lea.hbm %s1935_s0, 128 }
  0x17   :  { %p1641_p8 = scmp.ne.s32.totalorder %s1935_s0, %s1640_s29  ;;  %p1644_p9 = scmp.lt.u32.totalorder %s1640_s29, %s1935_s0 }
  0x19   :  { %p1646_p10 = pnand %p1644_p9, %p1641_p8 }
  0x1b   :  { %1649 = shalt.err (!%p1646_p10)
}
  0x1c   :  { %s1650_s2 = scalar_lea.vmem %s25_s24, 128  ;;  %p1655_p12 = scmp.lt.s32.totalorder %s25_s24, %s25_s24 }
  0x1d   :  { %p1651_p11 = scmp.ne.s32.totalorder %s25_s24, %s1650_s2  ;;  %p1656_p13 = scmp.lt.s32.totalorder %s1650_s2, %s1650_s2 }
  0x1f   :  { %p1657_p0 = por %p1656_p13, %p1655_p12 }
  0x21   :  { %p1658_p1 = pnand %p1657_p0, %p1651_p11 }
  0x23   :  { %1661 = shalt.err (!%p1658_p1)
}
  0x24   :  { %27 = dma.hbm_to_vmem [thread:$0]  %s1935_s0, 128, %s25_s24, [#allocation3]  }
  0x25   :  { %s1662_s17 = scalar_lea.hbm %s1940_s5, 24576 }
  0x26   :  { %p1663_p2 = scmp.ne.s32.totalorder %s1940_s5, %s1662_s17  ;;  %p1666_p3 = scmp.lt.u32.totalorder %s1662_s17, %s1940_s5 }
  0x28   :  { %p1668_p4 = pnand %p1666_p3, %p1663_p2 }
  0x2a   :  { %1671 = shalt.err (!%p1668_p4)
}
  0x2b   :  { %s1672_s22 = scalar_lea.vmem %s52_s26, 24576  ;;  %p1677_p6 = scmp.lt.s32.totalorder %s52_s26, %s52_s26 }
  0x2c   :  { %p1673_p5 = scmp.ne.s32.totalorder %s52_s26, %s1672_s22  ;;  %p1678_p7 = scmp.lt.s32.totalorder %s1672_s22, %s1672_s22 }
  0x2e   :  { %p1679_p8 = por %p1678_p7, %p1677_p6 }
  0x30   :  { %p1680_p9 = pnand %p1679_p8, %p1673_p5 }
  0x32   :  { %1683 = shalt.err (!%p1680_p9)
}
  0x33   :  { %s1741_s0 = smov 384   ;;  %s1742_s23 = smov 24  }
  0x34   :  { %57 = dma.hbm_to_vmem [thread:$0]  %s1940_s5, 24576, %s52_s26, [#allocation6], %s1741_s0, %s1741_s0, %s1742_s23  }
  0x35   :  { %s1743_s27 = smov [#allocation8]   ;;  %s1684_s11 = scalar_lea.hbm %s1942_s7, 6144 }
  0x36   :  { %s65_s28 = sshll.u32 %s1743_s27, 4  ;;  %p1685_p10 = scmp.ne.s32.totalorder %s1942_s7, %s1684_s11  ;;  %s66_s28 = int_to_ptr.vmem [resolvable:$true] %s65_s28 }
  0x37   :  { %p1688_p11 = scmp.lt.u32.totalorder %s1684_s11, %s1942_s7 }
  0x39   :  { %p1690_p12 = pnand %p1688_p11, %p1685_p10 }
  0x3b   :  { %1693 = shalt.err (!%p1690_p12)
}
  0x3c   :  { %s1694_s14 = scalar_lea.vmem %s66_s28, 6144  ;;  %p1699_p0 = scmp.lt.s32.totalorder %s66_s28, %s66_s28 }
  0x3d   :  { %p1695_p13 = scmp.ne.s32.totalorder %s66_s28, %s1694_s14  ;;  %p1700_p1 = scmp.lt.s32.totalorder %s1694_s14, %s1694_s14 }
  0x3f   :  { %p1701_p2 = por %p1700_p1, %p1699_p0 }
  0x41   :  { %p1702_p3 = pnand %p1701_p2, %p1695_p13 }
  0x43   :  { %1705 = shalt.err (!%p1702_p3)
}
  0x44   :  { %s1744_s5 = smov 128   ;;  %s1745_s26 = smov 8  }
  0x45   :  { %71 = dma.hbm_to_vmem [thread:$0]  %s1942_s7, 6144, %s66_s28, [#allocation9], %s1744_s5, %s1744_s5, %s1745_s26  }
  0x46   :  { %1728 = dma.done.wait [#allocation3], 128  }
  0x47   :  { %1729 = vsyncadd [#allocation3], 4294967168 }
  0x48   :  { %1730 = dma.done.wait [#allocation6], 25600  }
  0x49   :  { %1731 = vsyncadd [#allocation6], 4294941696 }
  0x4a   :  { %1732 = dma.done.wait [#allocation9], 6144  }
  0x4b   :  { %1733 = vsyncadd [#allocation9], 4294961152  ;;  %v1746_v0 = vmov 0.0   ;;  %vm106_vm0 = vcmask 1043456   ;;  %v96_v1 = vld [vmem:[%s1938_s3] sm:$0xff]  ;;  %v88_v2 = vld [vmem:[#allocation5 + $0x8] sm:$0xff] }
  0x4c   :  { %179 = vmatprep.mubr.f32.mxu0 %v1746_v0  ;;  %250 = vmatprep.mubr.f32.mxu1 %v1746_v0  ;;  %vm1747_vm1 = vmmov 1   ;;  %v100_v4 = vcombine.high %v96_v1, %v96_v1  ;;  %v92_v5 = vld [vmem:[#allocation5 + $0x28] sm:$0xf]  ;;  %v87_v6 = vld [vmem:[#allocation5] sm:$0xff]  ;;  %v95_v8 = vld [vmem:[%s1936_s1] sm:$0xff]  ;;  %vm102_vm3 = vcmask 31744  }
  0x4d   :  { %vm1855_vm2 = vmpackc.low %vm106_vm0, %vm1747_vm1  ;;  %v91_v7 = vld [vmem:[#allocation5 + $0x20] sm:$0xf]  ;;  %v1329_v9 = vpack.c.bf16 %v92_v5, %v88_v2  ;;  %v90_v12 = vld [vmem:[#allocation5 + $0x18] sm:$0xff]  ;;  %vm257_vm4 = vcmask 97280   ;;  %vm1749_vm5 = vmmov 0   ;;  %s1750_s23 = smov [#allocation10]  }
  0x4e   :  { %v1332_v10 = vpack.c.bf16 %v91_v7, %v87_v6  ;;  %v97_v11 = vld [vmem:[%s1938_s3 + $0x8] sm:$0xff]  ;;  %1158 = vmatprep.subr.msk.mxu0 %vm106_vm0, %v100_v4  ;;  %v94_v14 = vld [vmem:[#allocation5 + $0x38] sm:$0xf]  ;;  %v89_v15 = vld [vmem:[#allocation5 + $0x10] sm:$0xff]  ;;  %s1147_s24 = sshll.u32 %s1750_s23, 4  ;;  %s1148_s24 = int_to_ptr.vmem [resolvable:$true] %s1147_s24 }
  0x4f   :  { %v101_v13 = vcombine.high %v97_v11, %v97_v11  ;;  %v93_v16 = vld [vmem:[#allocation5 + $0x30] sm:$0xf]  ;;  %1159 = vmatpush1.msk.msra.mxu0 %vm106_vm0, %v96_v1  ;;  %v446_v17 = vld [vmem:[#allocation7 + $0x8] sm:$0xff]  ;;  %v449_v18 = vld [vmem:[#allocation7 + $0x20] sm:$0xff]  ;;  %v1335_v19 = vpack.c.bf16 %v94_v14, %v90_v12  ;;  %s1706_s25 = scalar_lea.vmem %s1148_s24, 128  ;;  %p1711_p5 = scmp.lt.s32.totalorder %s1148_s24, %s1148_s24 }
  0x50   :  { %1160 = vmatmul.mubr.msk.f32.vlgmr.msra.gmra.mrb[0].mxu0 %vm102_vm3, %v95_v8  ;;  %1331 = vmatprep.subr.msk.bf16.mxu0 %vm1855_vm2, %v1329_v9  ;;  %v1341_v20 = vpack.c.bf16 %v449_v18, %v446_v17  ;;  %v1338_v21 = vpack.c.bf16 %v93_v16, %v89_v15  ;;  %v445_v22 = vld [vmem:[#allocation7] sm:$0xff]  ;;  %v448_v23 = vld [vmem:[#allocation7 + $0x18] sm:$0xff]  ;;  %v455_v25 = vld [vmem:[#allocation7 + $0x50] sm:$0xff]  ;;  %p1707_p4 = scmp.ne.s32.totalorder %s1148_s24, %s1706_s25  ;;  %p1712_p6 = scmp.lt.s32.totalorder %s1706_s25, %s1706_s25 }
  0x51   :  { %1334 = vmatpush1.bf16.msk.msra.mxu0 %vm1855_vm2, %v1332_v10  ;;  %337 = vmatprep.mubr.f32.mxu0 %v1746_v0  ;;  %v452_v24 = vld [vmem:[#allocation7 + $0x38] sm:$0xff]  ;;  %v1343_v27 = vpack.c.bf16 %v448_v23, %v445_v22  ;;  %v451_v29 = vld [vmem:[#allocation7 + $0x30] sm:$0xff]  ;;  %v454_v30 = vld [vmem:[#allocation7 + $0x48] sm:$0xff] }
  0x52   :  { %1161 = vmatprep.subr.msk.mxu1 %vm106_vm0, %v101_v13  ;;  %1342 = vmatprep.subr.bf16.mxu0 %v1341_v20  ;;  %v86_v26 = vld [vmem:[#allocation2] sm:$0xff]  ;;  %v1345_v28 = vpack.c.bf16 %v455_v25, %v452_v24  ;;  %v458_v31 = vld [vmem:[#allocation7 + $0x68] sm:$0xff]  ;;  %v461_v32 = vld [vmem:[#allocation7 + $0x80] sm:$0xff]  ;;  %v1347_v33 = vpack.c.bf16 %v454_v30, %v451_v29  ;;  %p1713_p7 = por %p1712_p6, %p1711_p5 }
  0x53   :  { %1162 = vmatpush1.msk.msra.mxu1 %vm106_vm0, %v97_v11  ;;  %v457_v34 = vld [vmem:[#allocation7 + $0x60] sm:$0xff]  ;;  %v1349_v35 = vpack.c.bf16 %v461_v32, %v458_v31  ;;  %v460_v36 = vld [vmem:[#allocation7 + $0x78] sm:$0xff]  ;;  %v495_v37 = vld [vmem:[#allocation7 + $0x190] sm:$0xff] }
  0x54   :  { %1163 = vmatmul.mubr.msk.f32.vlgmr.msra.gmra.mrb[0].mxu1 %vm102_vm3, %v95_v8  ;;  %1337 = vmatprep.subr.msk.bf16.mxu1 %vm1855_vm2, %v1335_v19  ;;  %v498_v38 = vld [vmem:[#allocation7 + $0x1a8] sm:$0xff]  ;;  %v464_v39 = vld [vmem:[#allocation7 + $0x98] sm:$0xff]  ;;  %v467_v40 = vld [vmem:[#allocation7 + $0xb0] sm:$0xff]  ;;  %v1351_v44 = vpack.c.bf16 %v460_v36, %v457_v34  ;;  %p1714_p8 = pnand %p1713_p7, %p1707_p4 }
  0x55   :  { %1340 = vmatpush1.bf16.msk.msra.mxu1 %vm1855_vm2, %v1338_v21  ;;  %408 = vmatprep.mubr.f32.mxu1 %v1746_v0  ;;  %v1469_v41 = vpack.c.bf16 %v498_v38, %v495_v37  ;;  %v447_v42 = vld [vmem:[#allocation7 + $0x10] sm:$0xff]  ;;  %v450_v43 = vld [vmem:[#allocation7 + $0x28] sm:$0xff]  ;;  %v501_v47 = vld [vmem:[#allocation7 + $0x1c0] sm:$0xff]  ;;  %v1353_v49 = vpack.c.bf16 %v467_v40, %v464_v39 }
  0x56   :  { %v463_v45 = vld [vmem:[#allocation7 + $0x90] sm:$0xff]  ;;  %v1471_v46 = vpack.c.bf16 %v450_v43, %v447_v42  ;;  %v504_v48 = vld [vmem:[#allocation7 + $0x1d8] sm:$0xff]  ;;  %v466_v50 = vld [vmem:[#allocation7 + $0xa8] sm:$0xff] }
  0x57   :  { %1470 = vmatprep.subr.bf16.mxu1 %v1469_v41  ;;  %v1473_v51 = vpack.c.bf16 %v504_v48, %v501_v47  ;;  %v453_v52 = vld [vmem:[#allocation7 + $0x40] sm:$0xff]  ;;  %v456_v53 = vld [vmem:[#allocation7 + $0x58] sm:$0xff]  ;;  %v470_v54 = vld [vmem:[#allocation7 + $0xc8] sm:$0xff]  ;;  %v1355_v59 = vpack.c.bf16 %v466_v50, %v463_v45 }
  0x58   :  { %1166 = vmatmul.mubr.msk.f32.vlgmr.msra.gmra.mrb[0].mxu0 %vm257_vm4, %v86_v26  ;;  %v473_v55 = vld [vmem:[#allocation7 + $0xe0] sm:$0xff]  ;;  %v1475_v56 = vpack.c.bf16 %v456_v53, %v453_v52  ;;  %v507_v57 = vld [vmem:[#allocation7 + $0x1f0] sm:$0xff]  ;;  %v510_v58 = vld [vmem:[#allocation7 + $0x208] sm:$0xff] }
  0x59   :  { %1344 = vmatpush1.bf16.msra.mxu0 %v1343_v27  ;;  %v469_v60 = vld [vmem:[#allocation7 + $0xc0] sm:$0xff]  ;;  %v1477_v61 = vpack.c.bf16 %v510_v58, %v507_v57  ;;  %v459_v62 = vld [vmem:[#allocation7 + $0x70] sm:$0xff]  ;;  %v462_v63 = vld [vmem:[#allocation7 + $0x88] sm:$0xff]  ;;  %v1357_v1 = vpack.c.bf16 %v473_v55, %v470_v54 }
  0x5a   :  { %1346 = vmatprep.subr.bf16.mxu0 %v1345_v28  ;;  %v472_v2 = vld [vmem:[#allocation7 + $0xd8] sm:$0xff]  ;;  %v513_v3 = vld [vmem:[#allocation7 + $0x220] sm:$0xff]  ;;  %v479_v6 = vld [vmem:[#allocation7 + $0x110] sm:$0xff]  ;;  %v1479_v7 = vpack.c.bf16 %v462_v63, %v459_v62 }
  0x5b   :  { %v516_v4 = vld [vmem:[#allocation7 + $0x238] sm:$0xff]  ;;  %v465_v9 = vld [vmem:[#allocation7 + $0xa0] sm:$0xff]  ;;  %v1359_v11 = vpack.c.bf16 %v472_v2, %v469_v60  ;;  %v519_v12 = vld [vmem:[#allocation7 + $0x250] sm:$0xff] }
  0x5c   :  { %1169 = vmatmul.mubr.msk.f32.vlgmr.msra.gmra.mrb[0].mxu1 %vm257_vm4, %v86_v26  ;;  %v476_v5 = vld [vmem:[#allocation7 + $0xf8] sm:$0xff]  ;;  %v1481_v8 = vpack.c.bf16 %v516_v4, %v513_v3  ;;  %v522_v13 = vld [vmem:[#allocation7 + $0x268] sm:$0xff]  ;;  %v475_v15 = vld [vmem:[#allocation7 + $0xf0] sm:$0xff] }
  0x5d   :  { %1348 = vmatpush1.bf16.msra.mxu0 %v1347_v33  ;;  %1472 = vmatpush3.bf16.msra.mxu1 %v1471_v46  ;;  %v468_v10 = vld [vmem:[#allocation7 + $0xb8] sm:$0xff]  ;;  %v1361_v14 = vpack.c.bf16 %v479_v6, %v476_v5  ;;  %v478_v16 = vld [vmem:[#allocation7 + $0x108] sm:$0xff]  ;;  %v485_v18 = vld [vmem:[#allocation7 + $0x140] sm:$0xff]  ;;  %v1485_v20 = vpack.c.bf16 %v522_v13, %v519_v12 }
  0x5e   :  { %1350 = vmatprep.subr.bf16.mxu0 %v1349_v35  ;;  %1474 = vmatprep.subr.bf16.mxu1 %v1473_v51  ;;  %v482_v17 = vld [vmem:[#allocation7 + $0x128] sm:$0xff]  ;;  %v1483_v19 = vpack.c.bf16 %v468_v10, %v465_v9  ;;  %v471_v21 = vld [vmem:[#allocation7 + $0xd0] sm:$0xff]  ;;  %v1363_v23 = vpack.c.bf16 %v478_v16, %v475_v15  ;;  %v525_v24 = vld [vmem:[#allocation7 + $0x280] sm:$0xff] }
  0x5f   :  { %v474_v22 = vld [vmem:[#allocation7 + $0xe8] sm:$0xff]  ;;  %v528_v25 = vld [vmem:[#allocation7 + $0x298] sm:$0xff]  ;;  %v1365_v26 = vpack.c.bf16 %v485_v18, %v482_v17  ;;  %v481_v27 = vld [vmem:[#allocation7 + $0x120] sm:$0xff] }
  0x60   :  { %v484_v28 = vld [vmem:[#allocation7 + $0x138] sm:$0xff]  ;;  %v491_v30 = vld [vmem:[#allocation7 + $0x170] sm:$0xff]  ;;  %v1487_v31 = vpack.c.bf16 %v474_v22, %v471_v21  ;;  %v1489_v32 = vpack.c.bf16 %v528_v25, %v525_v24  ;;  %v477_v33 = vld [vmem:[#allocation7 + $0x100] sm:$0xff] }
  0x61   :  { %1352 = vmatpush1.bf16.msra.mxu0 %v1351_v44  ;;  %1476 = vmatpush3.bf16.msra.mxu1 %v1475_v56  ;;  %v488_v29 = vld [vmem:[#allocation7 + $0x158] sm:$0xff]  ;;  %v1367_v35 = vpack.c.bf16 %v484_v28, %v481_v27  ;;  %v531_v36 = vld [vmem:[#allocation7 + $0x2b0] sm:$0xff]  ;;  %v534_v37 = vld [vmem:[#allocation7 + $0x2c8] sm:$0xff] }
  0x62   :  { %1354 = vmatprep.subr.bf16.mxu0 %v1353_v49  ;;  %1478 = vmatprep.subr.bf16.mxu1 %v1477_v61  ;;  %v480_v34 = vld [vmem:[#allocation7 + $0x118] sm:$0xff]  ;;  %v1369_v38 = vpack.c.bf16 %v491_v30, %v488_v29  ;;  %v487_v39 = vld [vmem:[#allocation7 + $0x150] sm:$0xff]  ;;  %v490_v40 = vld [vmem:[#allocation7 + $0x168] sm:$0xff]  ;;  %v1493_v44 = vpack.c.bf16 %v534_v37, %v531_v36 }
  0x63   :  { %v494_v41 = vld [vmem:[#allocation7 + $0x188] sm:$0xff]  ;;  %v497_v42 = vld [vmem:[#allocation7 + $0x1a0] sm:$0xff]  ;;  %v1491_v43 = vpack.c.bf16 %v480_v34, %v477_v33  ;;  %v483_v45 = vld [vmem:[#allocation7 + $0x130] sm:$0xff]  ;;  %v1371_v47 = vpack.c.bf16 %v490_v40, %v487_v39 }
  0x64   :  { %v486_v46 = vld [vmem:[#allocation7 + $0x148] sm:$0xff]  ;;  %v1373_v48 = vpack.c.bf16 %v497_v42, %v494_v41  ;;  %v493_v49 = vld [vmem:[#allocation7 + $0x180] sm:$0xff]  ;;  %v496_v50 = vld [vmem:[#allocation7 + $0x198] sm:$0xff] }
  0x65   :  { %1356 = vmatpush1.bf16.msra.mxu0 %v1355_v59  ;;  %1480 = vmatpush3.bf16.msra.mxu1 %v1479_v7  ;;  %v500_v51 = vld [vmem:[#allocation7 + $0x1b8] sm:$0xff]  ;;  %v503_v52 = vld [vmem:[#allocation7 + $0x1d0] sm:$0xff]  ;;  %v1495_v53 = vpack.c.bf16 %v486_v46, %v483_v45  ;;  %v1375_v54 = vpack.c.bf16 %v496_v50, %v493_v49  ;;  %v502_v57 = vld [vmem:[#allocation7 + $0x1c8] sm:$0xff] }
  0x66   :  { %1358 = vmatprep.subr.bf16.mxu0 %v1357_v1  ;;  %1482 = vmatprep.subr.bf16.mxu1 %v1481_v8  ;;  %v1377_v55 = vpack.c.bf16 %v503_v52, %v500_v51  ;;  %v499_v56 = vld [vmem:[#allocation7 + $0x1b0] sm:$0xff]  ;;  %v506_v58 = vld [vmem:[#allocation7 + $0x1e8] sm:$0xff]  ;;  %v509_v59 = vld [vmem:[#allocation7 + $0x200] sm:$0xff] }
  0x67   :  { %v1379_v60 = vpack.c.bf16 %v502_v57, %v499_v56  ;;  %v1381_v61 = vpack.c.bf16 %v509_v59, %v506_v58  ;;  %v505_v62 = vld [vmem:[#allocation7 + $0x1e0] sm:$0xff]  ;;  %v508_v63 = vld [vmem:[#allocation7 + $0x1f8] sm:$0xff]  ;;  %v515_v2 = vld [vmem:[#allocation7 + $0x230] sm:$0xff] }
  0x68   :  { %v512_v1 = vld [vmem:[#allocation7 + $0x218] sm:$0xff]  ;;  %v1383_v3 = vpack.c.bf16 %v508_v63, %v505_v62  ;;  %v511_v5 = vld [vmem:[#allocation7 + $0x210] sm:$0xff]  ;;  %v514_v6 = vld [vmem:[#allocation7 + $0x228] sm:$0xff] }
  0x69   :  { %1360 = vmatpush1.bf16.msra.mxu0 %v1359_v11  ;;  %1484 = vmatpush3.bf16.msra.mxu1 %v1483_v19  ;;  %v1385_v4 = vpack.c.bf16 %v515_v2, %v512_v1  ;;  %v518_v7 = vld [vmem:[#allocation7 + $0x248] sm:$0xff]  ;;  %v521_v8 = vld [vmem:[#allocation7 + $0x260] sm:$0xff]  ;;  %v1387_v9 = vpack.c.bf16 %v514_v6, %v511_v5  ;;  %v520_v12 = vld [vmem:[#allocation7 + $0x258] sm:$0xff] }
  0x6a   :  { %1362 = vmatprep.subr.bf16.mxu0 %v1361_v14  ;;  %1486 = vmatprep.subr.bf16.mxu1 %v1485_v20  ;;  %v1389_v10 = vpack.c.bf16 %v521_v8, %v518_v7  ;;  %v517_v11 = vld [vmem:[#allocation7 + $0x240] sm:$0xff]  ;;  %v524_v13 = vld [vmem:[#allocation7 + $0x278] sm:$0xff]  ;;  %v527_v14 = vld [vmem:[#allocation7 + $0x290] sm:$0xff] }
  0x6b   :  { %v1391_v15 = vpack.c.bf16 %v520_v12, %v517_v11  ;;  %v1393_v16 = vpack.c.bf16 %v527_v14, %v524_v13  ;;  %v523_v17 = vld [vmem:[#allocation7 + $0x270] sm:$0xff]  ;;  %v526_v18 = vld [vmem:[#allocation7 + $0x288] sm:$0xff]  ;;  %v533_v20 = vld [vmem:[#allocation7 + $0x2c0] sm:$0xff] }
  0x6c   :  { %v530_v19 = vld [vmem:[#allocation7 + $0x2a8] sm:$0xff]  ;;  %v1395_v21 = vpack.c.bf16 %v526_v18, %v523_v17  ;;  %v532_v24 = vld [vmem:[#allocation7 + $0x2b8] sm:$0xff]  ;;  %v539_v27 = vld [vmem:[#allocation7 + $0x2f0] sm:$0xff] }
  0x6d   :  { %1364 = vmatpush1.bf16.msra.mxu0 %v1363_v23  ;;  %1488 = vmatpush3.bf16.msra.mxu1 %v1487_v31  ;;  %v1397_v22 = vpack.c.bf16 %v533_v20, %v530_v19  ;;  %v529_v23 = vld [vmem:[#allocation7 + $0x2a0] sm:$0xff]  ;;  %v540_v30 = vld [vmem:[#allocation7 + $0x2f8] sm:$0xff]  ;;  %v535_v31 = vld [vmem:[#allocation7 + $0x2d0] sm:$0xff] }
  0x6e   :  { %1366 = vmatprep.subr.bf16.mxu0 %v1365_v26  ;;  %1490 = vmatprep.subr.bf16.mxu1 %v1489_v32  ;;  %v1399_v25 = vpack.c.bf16 %v532_v24, %v529_v23  ;;  %v536_v26 = vld [vmem:[#allocation7 + $0x2d8] sm:$0xff]  ;;  %v537_v28 = vld [vmem:[#allocation7 + $0x2e0] sm:$0xff]  ;;  %v538_v32 = vld [vmem:[#allocation7 + $0x2e8] sm:$0xff] }
  0x6f   :  { %v1401_v29 = vpack.c.bf16 %v539_v27, %v536_v26  ;;  %v1497_v33 = vpack.c.bf16 %v540_v30, %v537_v28  ;;  %v1403_v34 = vpack.c.bf16 %v538_v32, %v535_v31  ;;  %v492_v36 = vld [vmem:[#allocation7 + $0x178] sm:$0xff]  ;;  %v545_v39 = vld [vmem:[#allocation7 + $0x320] sm:$0xff]  ;;  %v591_v40 = vld [vmem:[#allocation7 + $0x490] sm:$0xff] }
  0x70   :  { %v594_v42 = vld [vmem:[#allocation7 + $0x4a8] sm:$0xff]  ;;  %v543_v57 = vld [vmem:[#allocation7 + $0x310] sm:$0xff]  ;;  %v548_v59 = vld [vmem:[#allocation7 + $0x338] sm:$0xff] }
  0x71   :  { %1368 = vmatpush1.bf16.msra.mxu0 %v1367_v35  ;;  %1492 = vmatpush3.bf16.msra.mxu1 %v1491_v43  ;;  %v489_v35 = vld [vmem:[#allocation7 + $0x160] sm:$0xff]  ;;  %v1501_v43 = vpack.c.bf16 %v594_v42, %v591_v40  ;;  %v546_v58 = vld [vmem:[#allocation7 + $0x328] sm:$0xff]  ;;  %v600_v63 = vld [vmem:[#allocation7 + $0x4d8] sm:$0xff] }
  0x72   :  { %1370 = vmatprep.subr.bf16.mxu0 %v1369_v38  ;;  %1494 = vmatprep.subr.bf16.mxu1 %v1493_v44  ;;  %v1499_v37 = vpack.c.bf16 %v492_v36, %v489_v35  ;;  %v542_v38 = vld [vmem:[#allocation7 + $0x308] sm:$0xff]  ;;  %v417_v44 = vlaneseq  ;;  %v597_v62 = vld [vmem:[#allocation7 + $0x4c0] sm:$0xff]  ;;  %v547_v5 = vld [vmem:[#allocation7 + $0x330] sm:$0xff] }
  0x73   :  { %v1405_v41 = vpack.c.bf16 %v545_v39, %v542_v38  ;;  %v550_v6 = vld [vmem:[#allocation7 + $0x348] sm:$0xff]  ;;  %v549_v11 = vld [vmem:[#allocation7 + $0x340] sm:$0xff]  ;;  %v552_v12 = vld [vmem:[#allocation7 + $0x358] sm:$0xff] }
  0x74   :  { %v1883_v45 = vshrl.u32 %v417_v44, 7  ;;  %v554_v13 = vld [vmem:[#allocation7 + $0x368] sm:$0xff]  ;;  %v1411_v19 = vpack.c.bf16 %v550_v6, %v547_v5  ;;  %v1507_v20 = vpack.c.bf16 %v552_v12, %v549_v11  ;;  %v555_v26 = vld [vmem:[#allocation7 + $0x370] sm:$0xff]  ;;  %v560_v28 = vld [vmem:[#allocation7 + $0x398] sm:$0xff] }
  0x75   :  { %1372 = vmatpush1.bf16.msra.mxu0 %v1371_v47  ;;  %1496 = vmatpush3.bf16.msra.mxu1 %v1495_v53  ;;  %v1889_v47 = vld [vmem:[%s1939_s4] sm:$0xf]  ;;  %v541_v53 = vld [vmem:[#allocation7 + $0x300] sm:$0xff]  ;;  %v606_v17 = vld [vmem:[#allocation7 + $0x508] sm:$0xff] }
  0x76   :  { %1374 = vmatprep.subr.bf16.mxu0 %v1373_v48  ;;  %1498 = vmatprep.subr.bf16.mxu1 %v1497_v33  ;;  %v419_v46 = vsub.s32 0, %v1883_v45  ;;  %v423_v48 = vsub.s32 1, %v1883_v45  ;;  %v431_v51 = vsub.s32 3, %v1883_v45  ;;  %v558_v27 = vld [vmem:[#allocation7 + $0x388] sm:$0xff]  ;;  %v609_v30 = vld [vmem:[#allocation7 + $0x520] sm:$0xff]  ;;  %v612_v31 = vld [vmem:[#allocation7 + $0x538] sm:$0xff] }
  0x77   :  { %v1511_v33 = vpack.c.bf16 %v558_v27, %v555_v26  ;;  %v562_v35 = vld [vmem:[#allocation7 + $0x3a8] sm:$0xff]  ;;  %v561_v38 = vld [vmem:[#allocation7 + $0x3a0] sm:$0xff]  ;;  %v564_v39 = vld [vmem:[#allocation7 + $0x3b8] sm:$0xff] }
  0x78   :  { %v420_v49 = vrot.slane %v1889_v47, %v419_v46  ;;  %v424_v50 = vrot.slane %v1889_v47, %v423_v48  ;;  %v432_v1 = vrot.slane %v1889_v47, %v431_v51  ;;  %v566_v40 = vld [vmem:[#allocation7 + $0x3c8] sm:$0xff]  ;;  %v615_v42 = vld [vmem:[#allocation7 + $0x550] sm:$0xff]  ;;  %v568_v51 = vld [vmem:[#allocation7 + $0x3d8] sm:$0xff] }
  0x79   :  { %1376 = vmatpush1.bf16.msra.mxu0 %v1375_v54  ;;  %1500 = vmatpush3.bf16.msra.mxu1 %v1499_v37  ;;  %v544_v54 = vld [vmem:[#allocation7 + $0x318] sm:$0xff]  ;;  %v1513_v37 = vpack.c.bf16 %v612_v31, %v609_v30  ;;  %v578_v5 = vld [vmem:[#allocation7 + $0x428] sm:$0xff]  ;;  %v581_v6 = vld [vmem:[#allocation7 + $0x440] sm:$0xff] }
  0x7a   :  { %1378 = vmatprep.subr.bf16.mxu0 %v1377_v55  ;;  %1502 = vmatprep.subr.bf16.mxu1 %v1501_v43  ;;  %v618_v43 = vld [vmem:[#allocation7 + $0x568] sm:$0xff]  ;;  %v583_v26 = vld [vmem:[#allocation7 + $0x450] sm:$0xff]  ;;  %v585_v30 = vld [vmem:[#allocation7 + $0x460] sm:$0xff] }
  0x7b   :  { %v588_v31 = vld [vmem:[#allocation7 + $0x478] sm:$0xff] }
  0x7d   :  { %1380 = vmatpush1.bf16.msra.mxu0 %v1379_v60 }
  0x7e   :  { %1382 = vmatprep.subr.bf16.mxu0 %v1381_v61  ;;  %v551_v61 = vld [vmem:[#allocation7 + $0x350] sm:$0xff] }
  0x81   :  { %1384 = vmatpush1.bf16.msra.mxu0 %v1383_v3  ;;  %v1407_v3 = vpack.c.bf16 %v544_v54, %v541_v53  ;;  %v1517_v53 = vpack.c.bf16 %v618_v43, %v615_v42  ;;  %v567_v54 = vld [vmem:[#allocation7 + $0x3d0] sm:$0xff] }
  0x82   :  { %1386 = vmatprep.subr.bf16.mxu0 %v1385_v4  ;;  %v1503_v4 = vpack.c.bf16 %v546_v58, %v543_v57  ;;  %v575_v57 = vld [vmem:[#allocation7 + $0x410] sm:$0xff]  ;;  %v621_v58 = vld [vmem:[#allocation7 + $0x580] sm:$0xff] }
  0x85   :  { %1388 = vmatpush1.bf16.msra.mxu0 %v1387_v9  ;;  %v1409_v9 = vpack.c.bf16 %v551_v61, %v548_v59  ;;  %v624_v59 = vld [vmem:[#allocation7 + $0x598] sm:$0xff] }
  0x86   :  { %1390 = vmatprep.subr.bf16.mxu0 %v1389_v10  ;;  %v1505_v10 = vpack.c.bf16 %v600_v63, %v597_v62  ;;  %v571_v62 = vld [vmem:[#allocation7 + $0x3f0] sm:$0xff]  ;;  %v574_v63 = vld [vmem:[#allocation7 + $0x408] sm:$0xff] }
  0x87   :  { %v1427_v11 = vpack.c.bf16 %v574_v63, %v571_v62  ;;  %v617_v62 = vld [vmem:[#allocation7 + $0x560] sm:$0xff] }
  0x89   :  { %1392 = vmatpush1.bf16.msra.mxu0 %v1391_v15  ;;  %v557_v15 = vld [vmem:[#allocation7 + $0x380] sm:$0xff] }
  0x8a   :  { %1394 = vmatprep.subr.bf16.mxu0 %v1393_v16  ;;  %v603_v16 = vld [vmem:[#allocation7 + $0x4f0] sm:$0xff]  ;;  %v1413_v24 = vpack.c.bf16 %v557_v15, %v554_v13  ;;  %v577_v13 = vld [vmem:[#allocation7 + $0x420] sm:$0xff]  ;;  %v1429_v15 = vpack.c.bf16 %v581_v6, %v578_v5 }
  0x8b   :  { %v623_v5 = vld [vmem:[#allocation7 + $0x590] sm:$0xff] }
  0x8d   :  { %1396 = vmatpush1.bf16.msra.mxu0 %v1395_v21  ;;  %v553_v21 = vld [vmem:[#allocation7 + $0x360] sm:$0xff] }
  0x8e   :  { %1398 = vmatprep.subr.bf16.mxu0 %v1397_v22  ;;  %v556_v22 = vld [vmem:[#allocation7 + $0x378] sm:$0xff] }
  0x8f   :  { %v1415_v32 = vpack.c.bf16 %v556_v22, %v553_v21  ;;  %v633_v21 = vld [vmem:[#allocation7 + $0x5e0] sm:$0xff]  ;;  %v636_v22 = vld [vmem:[#allocation7 + $0x5f8] sm:$0xff] }
  0x91   :  { %1400 = vmatpush1.bf16.msra.mxu0 %v1399_v25  ;;  %v1509_v25 = vpack.c.bf16 %v606_v17, %v603_v16  ;;  %v579_v17 = vld [vmem:[#allocation7 + $0x430] sm:$0xff] }
  0x92   :  { %1402 = vmatprep.subr.bf16.mxu0 %v1401_v29  ;;  %v563_v29 = vld [vmem:[#allocation7 + $0x3b0] sm:$0xff] }
  0x93   :  { %v1417_v36 = vpack.c.bf16 %v563_v29, %v560_v28  ;;  %v1529_v28 = vpack.c.bf16 %v636_v22, %v633_v21  ;;  %v586_v29 = vld [vmem:[#allocation7 + $0x468] sm:$0xff]  ;;  %v631_v22 = vld [vmem:[#allocation7 + $0x5d0] sm:$0xff] }
  0x95   :  { %1404 = vmatpush1.bf16.msra.mxu0 %v1403_v34  ;;  %v559_v34 = vld [vmem:[#allocation7 + $0x390] sm:$0xff] }
  0x96   :  { %1406 = vmatprep.subr.bf16.mxu0 %v1405_v41  ;;  %v569_v41 = vld [vmem:[#allocation7 + $0x3e0] sm:$0xff]  ;;  %v1419_v44 = vpack.c.bf16 %v562_v35, %v559_v34  ;;  %v1531_v35 = vpack.c.bf16 %v588_v31, %v585_v30  ;;  %v957_v31 = vld [vmem:[#allocation8 + $0x90] sm:$0xff] }
 0x12b   :  { %v339_v52 = vpop.f32.mrb[0].mxu0 }
 0x12c   :  { %v437_v55 = vadd.f32 %v420_v49, %v339_v52  ;;  %v341_v56 = vpop.f32.mrb[1].mxu0  ;;  %v1515_v49 = vpack.c.bf16 %v564_v39, %v561_v38  ;;  %v1421_v52 = vpack.c.bf16 %v569_v41, %v566_v40  ;;  %v592_v38 = vld [vmem:[#allocation7 + $0x498] sm:$0xff]  ;;  %v599_v40 = vld [vmem:[#allocation7 + $0x4d0] sm:$0xff] }
 0x12d   :  { %v438_v60 = vadd.f32 %v424_v50, %v341_v56  ;;  %v565_v50 = vld [vmem:[#allocation7 + $0x3c0] sm:$0xff]  ;;  %v572_v56 = vld [vmem:[#allocation7 + $0x3f8] sm:$0xff] }
 0x12e   :  { %v441_v8 = vmax.f32 %v437_v55, 0.0  ;;  %v570_v55 = vld [vmem:[#allocation7 + $0x3e8] sm:$0xff]  ;;  %v596_v39 = vld [vmem:[#allocation7 + $0x4b8] sm:$0xff] }
 0x12f   :  { %v442_v2 = vmax.f32 %v438_v60, 0.0  ;;  %v1900_v7 = vpop.f32.mrb[0].mxu1  ;;  %v1423_v60 = vpack.c.bf16 %v568_v51, %v565_v50  ;;  %v1519_v61 = vpack.c.bf16 %v570_v55, %v567_v54  ;;  %v1441_v43 = vpack.c.bf16 %v599_v40, %v596_v39  ;;  %v605_v50 = vld [vmem:[#allocation7 + $0x500] sm:$0xff]  ;;  %v604_v54 = vld [vmem:[#allocation7 + $0x4f8] sm:$0xff]  ;;  %v944_v40 = vld [vmem:[#allocation8 + $0x28] sm:$0xff] }
 0x130   :  { %v412_v14 = vpop.f32.mrb[1].mxu1  ;;  %v608_v55 = vld [vmem:[#allocation7 + $0x518] sm:$0xff]  ;;  %v943_v39 = vld [vmem:[#allocation8 + $0x20] sm:$0xff] }
 0x131   :  { %718 = vmatprep.mubr.f32.mxu0 %v442_v2  ;;  %860 = vmatprep.mubr.f32.mxu1 %v442_v2  ;;  %v440_v18 = vadd.f32 %v432_v1, %v412_v14  ;;  %v1425_v1 = vpack.c.bf16 %v575_v57, %v572_v56  ;;  %v1521_v2 = vpack.c.bf16 %v624_v59, %v621_v58  ;;  %v580_v14 = vld [vmem:[#allocation7 + $0x438] sm:$0xff]  ;;  %v611_v56 = vld [vmem:[#allocation7 + $0x530] sm:$0xff] }
 0x132   :  { %719 = vmatmul.mubr.f32.vlgmr.msra.gmra.mrb[2].mxu0 %v441_v8  ;;  %861 = vmatmul.mubr.f32.vlgmr.msra.gmra.mrb[2].mxu1 %v441_v8  ;;  %v627_v8 = vld [vmem:[#allocation7 + $0x5b0] sm:$0xff]  ;;  %v1449_v58 = vpack.c.bf16 %v611_v56, %v608_v55  ;;  %v948_v55 = vld [vmem:[#allocation8 + $0x48] sm:$0xff] }
 0x133   :  { %1408 = vmatpush1.bf16.msra.mxu0 %v1407_v3  ;;  %1504 = vmatpush3.bf16.msra.mxu1 %v1503_v4  ;;  %v444_v23 = vmax.f32 %v440_v18, 0.0  ;;  %v573_v3 = vld [vmem:[#allocation7 + $0x400] sm:$0xff]  ;;  %v576_v4 = vld [vmem:[#allocation7 + $0x418] sm:$0xff]  ;;  %v582_v18 = vld [vmem:[#allocation7 + $0x448] sm:$0xff] }
 0x134   :  { %1410 = vmatprep.subr.bf16.mxu0 %v1409_v9  ;;  %1506 = vmatprep.subr.bf16.mxu1 %v1505_v10  ;;  %v630_v9 = vld [vmem:[#allocation7 + $0x5c8] sm:$0xff]  ;;  %v427_v10 = vsub.s32 2, %v1883_v45  ;;  %v1523_v12 = vpack.c.bf16 %v576_v4, %v573_v3  ;;  %v607_v59 = vld [vmem:[#allocation7 + $0x510] sm:$0xff]  ;;  %v616_v3 = vld [vmem:[#allocation7 + $0x558] sm:$0xff] }
 0x135   :  { %930 = vmatprep.mubr.f32.mxu1 %v444_v23  ;;  %789 = vmatprep.mubr.f32.mxu0 %v444_v23  ;;  %v1525_v16 = vpack.c.bf16 %v630_v9, %v627_v8  ;;  %v620_v4 = vld [vmem:[#allocation7 + $0x578] sm:$0xff]  ;;  %v619_v9 = vld [vmem:[#allocation7 + $0x570] sm:$0xff]  ;;  %v975_v45 = vld [vmem:[#allocation8 + $0x120] sm:$0xff] }
 0x136   :  { %v428_v23 = vrot.slane %v1889_v47, %v427_v10  ;;  %v1435_v47 = vpack.c.bf16 %v586_v29, %v583_v26  ;;  %v1457_v8 = vpack.c.bf16 %v623_v5, %v620_v4  ;;  %v956_v26 = vld [vmem:[#allocation8 + $0x88] sm:$0xff]  ;;  %v965_v56 = vld [vmem:[#allocation8 + $0xd0] sm:$0xff] }
 0x137   :  { %1412 = vmatpush1.bf16.msra.mxu0 %v1411_v19  ;;  %1508 = vmatpush3.bf16.msra.mxu1 %v1507_v20  ;;  %v584_v19 = vld [vmem:[#allocation7 + $0x458] sm:$0xff]  ;;  %v587_v20 = vld [vmem:[#allocation7 + $0x470] sm:$0xff]  ;;  %v940_v29 = vld [vmem:[#allocation8 + $0x8] sm:$0xff] }
 0x138   :  { %1414 = vmatprep.subr.bf16.mxu0 %v1413_v24  ;;  %1510 = vmatprep.subr.bf16.mxu1 %v1509_v25  ;;  %v1431_v24 = vpack.c.bf16 %v580_v14, %v577_v13  ;;  %v1527_v25 = vpack.c.bf16 %v582_v18, %v579_v17  ;;  %v1433_v27 = vpack.c.bf16 %v587_v20, %v584_v19  ;;  %v629_v13 = vld [vmem:[#allocation7 + $0x5c0] sm:$0xff]  ;;  %v628_v17 = vld [vmem:[#allocation7 + $0x5b8] sm:$0xff]  ;;  %v635_v19 = vld [vmem:[#allocation7 + $0x5f0] sm:$0xff] }
 0x139   :  { %v1907_v34 = vadd.f32 %v428_v23, %v1900_v7  ;;  %v595_v7 = vld [vmem:[#allocation7 + $0x4b0] sm:$0xff]  ;;  %v632_v18 = vld [vmem:[#allocation7 + $0x5d8] sm:$0xff]  ;;  %v634_v23 = vld [vmem:[#allocation7 + $0x5e8] sm:$0xff] }
 0x13a   :  { %v1465_v21 = vpack.c.bf16 %v635_v19, %v632_v18  ;;  %v952_v4 = vld [vmem:[#allocation8 + $0x68] sm:$0xff]  ;;  %v637_v18 = vld [vmem:[%s1941_s6] sm:$0x7] }
 0x13b   :  { %1416 = vmatpush1.bf16.msra.mxu0 %v1415_v32  ;;  %1512 = vmatpush3.bf16.msra.mxu1 %v1511_v33  ;;  %v590_v32 = vld [vmem:[#allocation7 + $0x488] sm:$0xff]  ;;  %v593_v33 = vld [vmem:[#allocation7 + $0x4a0] sm:$0xff]  ;;  %v443_v41 = vmax.f32 %v1907_v34, 0.0  ;;  %v650_v19 = vrot.slane %v637_v18, %v427_v10 }
 0x13c   :  { %1418 = vmatprep.subr.bf16.mxu0 %v1417_v36  ;;  %1514 = vmatprep.subr.bf16.mxu1 %v1513_v37  ;;  %v1437_v36 = vpack.c.bf16 %v593_v33, %v590_v32  ;;  %v589_v37 = vld [vmem:[#allocation7 + $0x480] sm:$0xff]  ;;  %v958_v32 = vld [vmem:[#allocation8 + $0x98] sm:$0xff]  ;;  %v941_v33 = vld [vmem:[#allocation8 + $0x10] sm:$0xff] }
 0x13d   :  { %v1439_v42 = vpack.c.bf16 %v592_v38, %v589_v37  ;;  %v1537_v34 = vpack.c.bf16 %v958_v32, %v957_v31  ;;  %v972_v31 = vld [vmem:[#allocation8 + $0x108] sm:$0xff] }
 0x13f   :  { %1420 = vmatpush1.bf16.msra.mxu0 %v1419_v44  ;;  %1516 = vmatpush3.bf16.msra.mxu1 %v1515_v49  ;;  %v598_v44 = vld [vmem:[#allocation7 + $0x4c8] sm:$0xff] }
 0x140   :  { %1422 = vmatprep.subr.bf16.mxu0 %v1421_v52  ;;  %1518 = vmatprep.subr.bf16.mxu1 %v1517_v53  ;;  %v602_v49 = vld [vmem:[#allocation7 + $0x4e8] sm:$0xff]  ;;  %v1443_v51 = vpack.c.bf16 %v598_v44, %v595_v7  ;;  %v601_v53 = vld [vmem:[#allocation7 + $0x4e0] sm:$0xff]  ;;  %v945_v44 = vld [vmem:[#allocation8 + $0x30] sm:$0xff] }
 0x141   :  { %v1445_v52 = vpack.c.bf16 %v605_v50, %v602_v49  ;;  %v1447_v57 = vpack.c.bf16 %v604_v54, %v601_v53  ;;  %v946_v49 = vld [vmem:[#allocation8 + $0x38] sm:$0xff]  ;;  %v963_v50 = vld [vmem:[#allocation8 + $0xc0] sm:$0xff] }
 0x142   :  { %v947_v54 = vld [vmem:[#allocation8 + $0x40] sm:$0xff] }
 0x143   :  { %1424 = vmatpush1.bf16.msra.mxu0 %v1423_v60  ;;  %1520 = vmatpush3.bf16.msra.mxu1 %v1519_v61  ;;  %v610_v60 = vld [vmem:[#allocation7 + $0x528] sm:$0xff] }
 0x144   :  { %1426 = vmatprep.subr.bf16.mxu0 %v1425_v1  ;;  %1522 = vmatprep.subr.bf16.mxu1 %v1521_v2  ;;  %v614_v61 = vld [vmem:[#allocation7 + $0x548] sm:$0xff]  ;;  %v1451_v63 = vpack.c.bf16 %v610_v60, %v607_v59  ;;  %v613_v2 = vld [vmem:[#allocation7 + $0x540] sm:$0xff]  ;;  %v949_v60 = vld [vmem:[#allocation8 + $0x50] sm:$0xff] }
 0x145   :  { %v1453_v1 = vpack.c.bf16 %v617_v62, %v614_v61  ;;  %v1455_v6 = vpack.c.bf16 %v616_v3, %v613_v2  ;;  %v950_v61 = vld [vmem:[#allocation8 + $0x58] sm:$0xff]  ;;  %v967_v62 = vld [vmem:[#allocation8 + $0xe0] sm:$0xff] }
 0x146   :  { %v951_v3 = vld [vmem:[#allocation8 + $0x60] sm:$0xff] }
 0x147   :  { %1428 = vmatpush1.bf16.msra.mxu0 %v1427_v11  ;;  %1524 = vmatpush3.bf16.msra.mxu1 %v1523_v12  ;;  %v622_v11 = vld [vmem:[#allocation7 + $0x588] sm:$0xff]  ;;  %v1559_v5 = vpack.c.bf16 %v952_v4, %v951_v3 }
 0x148   :  { %1430 = vmatprep.subr.bf16.mxu0 %v1429_v15  ;;  %1526 = vmatprep.subr.bf16.mxu1 %v1525_v16  ;;  %v626_v12 = vld [vmem:[#allocation7 + $0x5a8] sm:$0xff]  ;;  %v1459_v14 = vpack.c.bf16 %v622_v11, %v619_v9  ;;  %v625_v16 = vld [vmem:[#allocation7 + $0x5a0] sm:$0xff]  ;;  %v953_v11 = vld [vmem:[#allocation8 + $0x70] sm:$0xff] }
 0x149   :  { %v1461_v15 = vpack.c.bf16 %v629_v13, %v626_v12  ;;  %v1463_v20 = vpack.c.bf16 %v628_v17, %v625_v16  ;;  %v954_v12 = vld [vmem:[#allocation8 + $0x78] sm:$0xff] }
 0x14a   :  { %v1563_v13 = vpack.c.bf16 %v954_v12, %v953_v11 }
 0x14b   :  { %1432 = vmatpush1.bf16.msra.mxu0 %v1431_v24  ;;  %1528 = vmatpush3.bf16.msra.mxu1 %v1527_v25  ;;  %v1467_v24 = vpack.c.bf16 %v634_v23, %v631_v22  ;;  %v955_v25 = vld [vmem:[#allocation8 + $0x80] sm:$0xff] }
 0x14c   :  { %1434 = vmatprep.subr.bf16.mxu0 %v1433_v27  ;;  %1530 = vmatprep.subr.bf16.mxu1 %v1529_v28  ;;  %v1533_v27 = vpack.c.bf16 %v956_v26, %v955_v25  ;;  %v939_v28 = vld [vmem:[#allocation8] sm:$0xff]  ;;  %v642_v25 = vrot.slane %v637_v18, %v419_v46  ;;  %v646_v26 = vrot.slane %v637_v18, %v423_v48  ;;  %v976_v46 = vld [vmem:[#allocation8 + $0x128] sm:$0xff] }
 0x14d   :  { %v1535_v30 = vpack.c.bf16 %v940_v29, %v939_v28  ;;  %v1572_v48 = vpack.c.bf16 %v976_v46, %v975_v45 }
 0x14f   :  { %1436 = vmatpush1.bf16.msra.mxu0 %v1435_v47  ;;  %1532 = vmatpush3.bf16.msra.mxu1 %v1531_v35  ;;  %v942_v47 = vld [vmem:[#allocation8 + $0x18] sm:$0xff]  ;;  %v959_v35 = vld [vmem:[#allocation8 + $0xa0] sm:$0xff] }
 0x150   :  { %1438 = vmatprep.subr.bf16.mxu0 %v1437_v36  ;;  %1534 = vmatprep.subr.bf16.mxu1 %v1533_v27  ;;  %v960_v36 = vld [vmem:[#allocation8 + $0xa8] sm:$0xff]  ;;  %v1539_v37 = vpack.c.bf16 %v942_v47, %v941_v33  ;;  %v973_v47 = vld [vmem:[#allocation8 + $0x110] sm:$0xff] }
 0x151   :  { %v1541_v38 = vpack.c.bf16 %v960_v36, %v959_v35  ;;  %v974_v35 = vld [vmem:[#allocation8 + $0x118] sm:$0xff] }
 0x152   :  { %931 = vmatmul.mubr.f32.vlgmr.msra.gmra.mrb[4].mxu1 %v443_v41  ;;  %v1569_v36 = vpack.c.bf16 %v974_v35, %v973_v47 }
 0x153   :  { %1440 = vmatpush1.bf16.msra.mxu0 %v1439_v42  ;;  %1536 = vmatpush3.bf16.msra.mxu1 %v1535_v30  ;;  %v962_v42 = vld [vmem:[#allocation8 + $0xb8] sm:$0xff]  ;;  %v971_v30 = vld [vmem:[#allocation8 + $0x100] sm:$0xff] }
 0x154   :  { %1442 = vmatprep.subr.bf16.mxu0 %v1441_v43  ;;  %1538 = vmatprep.subr.bf16.mxu1 %v1537_v34  ;;  %v1543_v43 = vpack.c.bf16 %v944_v40, %v943_v39  ;;  %v1566_v34 = vpack.c.bf16 %v972_v31, %v971_v30  ;;  %v979_v40 = vld [vmem:[#allocation8 + $0x140] sm:$0xff] }
 0x157   :  { %1444 = vmatpush1.bf16.msra.mxu0 %v1443_v51  ;;  %1540 = vmatpush3.bf16.msra.mxu1 %v1539_v37  ;;  %v964_v51 = vld [vmem:[#allocation8 + $0xc8] sm:$0xff]  ;;  %v977_v37 = vld [vmem:[#allocation8 + $0x130] sm:$0xff] }
 0x158   :  { %1446 = vmatprep.subr.bf16.mxu0 %v1445_v52  ;;  %1542 = vmatprep.subr.bf16.mxu1 %v1541_v38  ;;  %v1547_v52 = vpack.c.bf16 %v946_v49, %v945_v44  ;;  %v1549_v53 = vpack.c.bf16 %v964_v51, %v963_v50  ;;  %v978_v38 = vld [vmem:[#allocation8 + $0x138] sm:$0xff]  ;;  %v983_v44 = vld [vmem:[#allocation8 + $0x160] sm:$0xff]  ;;  %v984_v49 = vld [vmem:[#allocation8 + $0x168] sm:$0xff] }
 0x159   :  { %v1575_v39 = vpack.c.bf16 %v978_v38, %v977_v37  ;;  %v1584_v50 = vpack.c.bf16 %v984_v49, %v983_v44  ;;  %v985_v51 = vld [vmem:[#allocation8 + $0x170] sm:$0xff] }
 0x15b   :  { %1448 = vmatpush1.bf16.msra.mxu0 %v1447_v57  ;;  %1544 = vmatpush3.bf16.msra.mxu1 %v1543_v43  ;;  %v966_v57 = vld [vmem:[#allocation8 + $0xd8] sm:$0xff]  ;;  %v981_v43 = vld [vmem:[#allocation8 + $0x150] sm:$0xff] }
 0x15c   :  { %1450 = vmatprep.subr.bf16.mxu0 %v1449_v58  ;;  %v1551_v58 = vpack.c.bf16 %v948_v55, %v947_v54  ;;  %v1553_v59 = vpack.c.bf16 %v966_v57, %v965_v56 }
 0x15f   :  { %1452 = vmatpush1.bf16.msra.mxu0 %v1451_v63  ;;  %v968_v63 = vld [vmem:[#allocation8 + $0xe8] sm:$0xff] }
 0x160   :  { %1454 = vmatprep.subr.bf16.mxu0 %v1453_v1  ;;  %v1555_v1 = vpack.c.bf16 %v950_v61, %v949_v60  ;;  %v1557_v2 = vpack.c.bf16 %v968_v63, %v967_v62 }
 0x163   :  { %1456 = vmatpush1.bf16.msra.mxu0 %v1455_v6  ;;  %v969_v6 = vld [vmem:[#allocation8 + $0xf0] sm:$0xff] }
 0x164   :  { %1458 = vmatprep.subr.bf16.mxu0 %v1457_v8  ;;  %v970_v8 = vld [vmem:[#allocation8 + $0xf8] sm:$0xff] }
 0x165   :  { %v1561_v9 = vpack.c.bf16 %v970_v8, %v969_v6 }
 0x167   :  { %1460 = vmatpush1.bf16.msra.mxu0 %v1459_v14  ;;  %v1748_v14 = vmov 0.0|0.0  }
 0x168   :  { %1462 = vmatprep.subr.bf16.mxu0 %v1461_v15 }
 0x16b   :  { %1464 = vmatpush1.bf16.msra.mxu0 %v1463_v20 }
 0x16c   :  { %1466 = vmatprep.subr.bf16.mxu0 %v1465_v21 }
 0x16f   :  { %1468 = vmatpush1.bf16.msra.mxu0 %v1467_v24 }
 0x172   :  { %790 = vmatmul.mubr.f32.vlgmr.msra.gmra.mrb[2].mxu0 %v443_v41  ;;  %v961_v41 = vld [vmem:[#allocation8 + $0xb0] sm:$0xff] }
 0x173   :  { %v1545_v7 = vpack.c.bf16 %v962_v42, %v961_v41  ;;  %v980_v41 = vld [vmem:[#allocation8 + $0x148] sm:$0xff] }
 0x174   :  { %v1578_v42 = vpack.c.bf16 %v980_v41, %v979_v40 }
 0x175   :  { %1546 = vmatprep.subr.bf16.mxu1 %v1545_v7  ;;  %v982_v7 = vld [vmem:[#allocation8 + $0x158] sm:$0xff] }
 0x176   :  { %1548 = vmatpush3.bf16.msra.mxu1 %v1547_v52  ;;  %v986_v52 = vld [vmem:[#allocation8 + $0x178] sm:$0xff] }
 0x177   :  { %1550 = vmatprep.subr.bf16.mxu1 %v1549_v53  ;;  %v1587_v53 = vpack.c.bf16 %v986_v52, %v985_v51 }
 0x17a   :  { %1552 = vmatpush3.bf16.msra.mxu1 %v1551_v58  ;;  %v1170_v58 = vld [vmem:[%s1943_s8] ss:$0 sm:$0xff] }
 0x17b   :  { %1554 = vmatprep.subr.bf16.mxu1 %v1553_v59 }
 0x17e   :  { %1556 = vmatpush3.bf16.msra.mxu1 %v1555_v1 }
 0x17f   :  { %1558 = vmatprep.subr.bf16.mxu1 %v1557_v2 }
 0x182   :  { %1560 = vmatpush3.bf16.msra.mxu1 %v1559_v5 }
 0x183   :  { %1562 = vmatprep.subr.bf16.mxu1 %v1561_v9 }
 0x186   :  { %1564 = vmatpush3.bf16.msra.mxu1 %v1563_v13 }
 0x187   :  { %1565 = vmatprep.subr.bf16.mxu1 %v1748_v14 }
 0x205   :  { %v1204_v15 = vpop.f32.mrb[2].mxu1 }
 0x206   :  { %v1205_v16 = vpop.f32.mrb[3].mxu1 }
 0x207   :  { %v1206_v17 = vadd.f32 %v1205_v16, %v1204_v15 }
 0x209   :  { %v863_v22 = vadd.f32 %v1206_v17, %v650_v19 }
 0x225   :  { %v1239_v20 = vpop.f32.mrb[4].mxu1 }
 0x226   :  { %v1240_v21 = vpop.f32.mrb[5].mxu1 }
 0x227   :  { %v1241_v23 = vadd.f32 %v1240_v21, %v1239_v20 }
 0x229   :  { %v933_v24 = vadd.f32 %v1241_v23, %v863_v22 }
 0x22b   :  { %v938_v54 = vmax.f32 %v933_v24, 0.0 }
 0x245   :  { %v791_v27 = vpop.f32.mrb[2].mxu0 }
 0x246   :  { %v1589_v28 = vadd.f32 %v791_v27, %v642_v25  ;;  %v793_v29 = vpop.f32.mrb[3].mxu0 }
 0x247   :  { %v1590_v32 = vadd.f32 %v793_v29, %v646_v26 }
 0x248   :  { %v936_v10 = vmax.f32 %v1589_v28, 0.0 }
 0x249   :  { %v937_v33 = vmax.f32 %v1590_v32, 0.0 }
 0x24b   :  { %1058 = vmatprep.mubr.f32.mxu1 %v937_v33 }
 0x24c   :  { %1059 = vmatmul.mubr.f32.vlgmr.msra.gmra.mrb[6].mxu1 %v936_v10 }
 0x24d   :  { %1567 = vmatpush3.bf16.msra.mxu1 %v1566_v34  ;;  %1326 = vmatprep.mubr.msk.f32.mxu1 %vm1749_vm5, %v1746_v0  ;;  %v1581_v0 = vpack.c.bf16 %v982_v7, %v981_v43 }
 0x24e   :  { %1568 = vmatprep.subr.bf16.mxu1 %v1748_v14 }
 0x251   :  { %1570 = vmatpush3.bf16.msra.mxu1 %v1569_v36 }
 0x252   :  { %1571 = vmatprep.subr.bf16.mxu1 %v1748_v14 }
 0x255   :  { %1573 = vmatpush3.bf16.msra.mxu1 %v1572_v48 }
 0x256   :  { %1574 = vmatprep.subr.bf16.mxu1 %v1748_v14 }
 0x259   :  { %1576 = vmatpush3.bf16.msra.mxu1 %v1575_v39 }
 0x25a   :  { %1577 = vmatprep.subr.bf16.mxu1 %v1748_v14 }
 0x25d   :  { %1579 = vmatpush3.bf16.msra.mxu1 %v1578_v42 }
 0x25e   :  { %1580 = vmatprep.subr.bf16.mxu1 %v1748_v14 }
 0x261   :  { %1582 = vmatpush3.bf16.msra.mxu1 %v1581_v0 }
 0x262   :  { %1583 = vmatprep.subr.bf16.mxu1 %v1748_v14 }
 0x265   :  { %1585 = vmatpush3.bf16.msra.mxu1 %v1584_v50 }
 0x266   :  { %1586 = vmatprep.subr.bf16.mxu1 %v1748_v14 }
 0x269   :  { %1588 = vmatpush3.bf16.msra.mxu1 %v1587_v53 }
 0x26c   :  { %1327 = vmatmul.mubr.f32.vlgmr.msra.gmra.mrb[8].mxu1 %v938_v54 }
 0x31f   :  { %v1274_v55 = vpop.f32.mrb[6].mxu1 }
 0x320   :  { %v1275_v56 = vpop.f32.mrb[7].mxu1 }
 0x321   :  { %v1276_v57 = vadd.f32 %v1275_v56, %v1274_v55 }
 0x323   :  { %v1061_v59 = vadd.f32 %v1276_v57, %v1170_v58 }
 0x33f   :  { %v1130_v60 = vpop.f32.mrb[8].mxu1 }
 0x340   :  { %v1131_v61 = vadd.f32 %v1130_v60, %v1061_v59  ;;  %v1328_v62 = vpop.f32.mrb[9].mxu1 }
 0x342   :  { %v1171_v63 = vmul.f32 -1.442695, %v1131_v61 }
 0x344   :  { %1614 = vpow2.f32 %v1171_v63 }
 0x34e   :  { %v1615_v1 = vpop.eup %1614 }
 0x34f   :  { %v1137_v2 = vadd.f32 1.0, %v1615_v1 }
 0x351   :  { %1616 = vrcp.f32 %v1137_v2 }
 0x35b   :  { %v1617_v3 = vpop.eup %1616 }
 0x35c   :  { %1140 = vst [vmem:[#allocation10] sm:$0xff] %v1617_v3 }
 0x35d   :  { %1717 = shalt.err (!%p1714_p8)
}
 0x35e   :  { %s1718_s28 = scalar_lea.hbm %s1944_s9, 128 }
 0x35f   :  { %p1719_p9 = scmp.ne.s32.totalorder %s1944_s9, %s1718_s28  ;;  %p1722_p10 = scmp.lt.u32.totalorder %s1718_s28, %s1944_s9 }
 0x361   :  { %p1724_p11 = pnand %p1722_p10, %p1719_p9 }
 0x363   :  { %1727 = shalt.err (!%p1724_p11)
}
 0x364   :  { %1150 = dma.vmem_to_hbm [thread:$0]  %s1148_s24, 128, %s1944_s9, [#allocation4]  }
 0x365   :  { %1734 = dma.done.wait [#allocation4], 128  }
 0x366   :  { %1735 = vsyncadd [#allocation4], 4294967168 }
 0x367   :  { %1154 = vsyncpa [#allocation3], 1 }
 0x368   :  { %1155 = vsyncpa [#allocation6], 1 }
 0x369   :  { %1156 = vsyncpa [#allocation9], 1 }
 0x36a   :  { %1157 = vsyncpa [#allocation4], 1 }

</bundles_post_ra>
